<compile_context>
chip_gen: v5e
topology: v5e:2x2
jax: 0.10.0
libtpu: 0.0.40
codegen_flags: <defaults>
</compile_context>

<pallas_src>
import math

import jax
import jax.numpy as jnp
from jax.experimental import pallas as pl
from jax.experimental.pallas import tpu as pltpu

_GELU_C = math.sqrt(2.0 / math.pi)


def _ffn_kernel(x_ref, wfc_ref, wproj_ref, o_ref, acc_ref):
    # x_ref:     (tm, C)   tile of flattened input rows (native dtype)
    # wfc_ref:   (C, th)   slice of W_fc.T  (native dtype; resident if th == H)
    # wproj_ref: (th, C)   slice of W_proj.T (native dtype; resident if th == H)
    # o_ref:     (tm, C)   output tile (resident across the H axis)
    # acc_ref:   (tm, C)   f32 accumulator scratch
    j = pl.program_id(1)

    @pl.when(j == 0)
    def _():
        acc_ref[...] = jnp.zeros_like(acc_ref)

    # First projection slice: (tm, C) @ (C, th) -> (tm, th), f32 MXU accumulate.
    h = jnp.dot(x_ref[...], wfc_ref[...], preferred_element_type=jnp.float32)

    # new_gelu (tanh approximation) in f32: tanh goes to the EUP slot,
    # polynomial muls stay on the VPU.
    h = 0.5 * h * (1.0 + jnp.tanh(_GELU_C * (h + 0.044715 * (h * h * h))))

    # Second projection slice: (tm, th) @ (th, C) accumulated into (tm, C).
    acc_ref[...] += jnp.dot(h.astype(wproj_ref.dtype), wproj_ref[...],
                            preferred_element_type=jnp.float32)

    @pl.when(j == pl.num_programs(1) - 1)
    def _():
        # Dropout: inference semantics (identity).
        # TODO(synk): training-mode dropout (PRNG mask + 1/(1-p) scale) not implemented.
        o_ref[...] = acc_ref[...].astype(o_ref.dtype)


def _round_up(v, m):
    return ((v + m - 1) // m) * m


def _sublane(itemsize):
    # dtype-native sublane multiple: f32 -> 8, bf16 -> 16, int8/fp8 -> 32.
    return {4: 8, 2: 16, 1: 32}.get(itemsize, 8)


def _vmem_budget_bytes():
    """~82% of physical VMEM: leaves headroom for Mosaic internal scratch.

    v5e/v6e: ~105 MiB of 128 MiB; v7x: ~52 MiB of 64 MiB.
    """
    try:
        cap = pltpu.get_tpu_info().vmem_capacity_bytes
    except Exception:
        cap = 64 * 1024 * 1024  # conservative fallback
    return int(cap * 0.82)


def _vmem_footprint(tm, th, C, xi, wi, oi):
    """Actual buffer counts + 25% headroom (no double counting)."""
    buf = (2 * tm * C * xi                 # x tiles (double-buffered)
           + 2 * tm * C * oi               # output tiles (double-buffered)
           + 2 * (C * th + th * C) * wi    # weight tiles (double-buffered)
           + tm * C * 4                    # f32 accumulator scratch
           + 2 * tm * th * 4)              # f32 matmul/GELU intermediates
    return int(buf * 1.25)


def _select_tiles(M, C, H, xi, wi, oi, budget, sublane):
    """Pick (tm, th).

    Priority 1: full weight residency (th = H) with a healthy row tile — the
    weights are DMA'd exactly once (constant index map across the row axis).
    Priority 2: stream weight slices; maximize the row tile first (it sets the
    arithmetic intensity, ~2*tm/itemsize flops/byte), then the largest
    MXU-friendly hidden slice (>=256) that fits the VMEM budget.
    """
    # Row-tile candidates: sublane multiples, capped so grid_m >= 2 whenever
    # M allows (keeps both v7x TensorCores busy for small M).
    if M >= 2 * sublane:
        tm_cap = _round_up(pl.cdiv(M, 2), sublane)
    else:
        tm_cap = _round_up(max(M, 1), sublane)
    tm_cands = sorted(
        {tm_cap} | {t for t in (1024, 768, 512, 384, 256, 128, 64, 32, 16, 8)
                    if t <= tm_cap and t % sublane == 0},
        reverse=True)

    # Hidden-dim candidates: full H first (residency), then >=256 divisors.
    th_cands = [H] + [t for t in (2048, 1536, 1024, 768, 512, 256, 128)
                      if t < H and H % t == 0]

    # 1) Residency.
    min_good_tm = min(256, tm_cap)
    for tm in tm_cands:
        if tm < min_good_tm:
            break
        if _vmem_footprint(tm, H, C, xi, wi, oi) <= budget:
            return tm, H

    # 2) Streaming: biggest row tile, then biggest hidden slice that fits.
    for tm in tm_cands:
        for th in th_cands:
            if _vmem_footprint(tm, th, C, xi, wi, oi) <= budget:
                return tm, th

    # 3) Best-effort fallback.
    return tm_cands[-1], th_cands[-1]


def prepare_ffn_params(w_fc, w_proj, dtype=None):
    """One-time (outside the per-call path) transpose / cast of the weights.

    w_fc:   (4C, C)  PyTorch nn.Linear layout
    w_proj: (C, 4C)  PyTorch nn.Linear layout
    Returns (W_fc.T, W_proj.T).  Pass dtype=jnp.bfloat16 for the fast MXU path
    (halves weight DMA, ~2-4x MXU throughput; accumulation stays f32).
    """
    wfc_t = w_fc.T       # (C, 4C)
    wproj_t = w_proj.T   # (4C, C)
    if dtype is not None:
        wfc_t = wfc_t.astype(dtype)
        wproj_t = wproj_t.astype(dtype)
    return jnp.asarray(wfc_t), jnp.asarray(wproj_t)


@jax.jit
def feed_forward(x, wfc_t, wproj_t):
    """x: (B, T, C). wfc_t: (C, 4C) = W_fc.T. wproj_t: (4C, C) = W_proj.T."""
    B, T, C = x.shape
    Ct, H = wfc_t.shape
    assert Ct == C and wproj_t.shape == (H, C)

    M = B * T
    xi = x.dtype.itemsize
    wi = wfc_t.dtype.itemsize
    oi = xi
    sublane = _sublane(xi)

    budget = _vmem_budget_bytes()
    tm, th = _select_tiles(M, C, H, xi, wi, oi, budget, sublane)

    grid = (pl.cdiv(M, tm), H // th)

    # Free reshape, no pad: Pallas masks the ragged last row block, and the
    # kernel never reduces across M, so garbage rows stay confined to the
    # masked-off region.
    x2 = x.reshape(M, C)

    weight_bytes = 2 * C * H * wi
    cost = pl.CostEstimate(
        flops=4 * M * C * H,              # two matmuls, 2*M*C*H each
        transcendentals=M * H,            # tanh per hidden element
        bytes_accessed=(2 * M * C * xi
                        + (weight_bytes if th == H else weight_bytes * grid[0])),
    )

    vmem_limit = int(min(budget,
                         max(_vmem_footprint(tm, th, C, xi, wi, oi),
                             16 * 1024 * 1024)))

    out2 = pl.pallas_call(
        _ffn_kernel,
        out_shape=jax.ShapeDtypeStruct((M, C), x.dtype),
        grid_spec=pltpu.PrefetchScalarGridSpec(
            num_scalar_prefetch=0,
            grid=grid,
            in_specs=[
                pl.BlockSpec((tm, C), lambda i, j: (i, 0)),   # x rows
                pl.BlockSpec((C, th), lambda i, j: (0, j)),   # W_fc.T slice (DMA'd once if th==H)
                pl.BlockSpec((th, C), lambda i, j: (j, 0)),   # W_proj.T slice (DMA'd once if th==H)
            ],
            out_specs=pl.BlockSpec((tm, C), lambda i, j: (i, 0)),
            scratch_shapes=[pltpu.VMEM((tm, C), jnp.float32)],
        ),
        compiler_params=pltpu.CompilerParams(
            dimension_semantics=("parallel", "arbitrary"),
            vmem_limit_bytes=vmem_limit,
        ),
        cost_estimate=cost,
    )(x2, wfc_t, wproj_t)

    return out2.reshape(B, T, C)


def _reference(x, w_fc, w_proj):
    h = jnp.einsum("btc,hc->bth", x, w_fc)
    h = 0.5 * h * (1.0 + jnp.tanh(_GELU_C * (h + 0.044715 * h ** 3)))
    return jnp.einsum("bth,ch->btc", h, w_proj)


if __name__ == "__main__":
    # Small config: batch=2, seq=8, n_embd=32 -> hidden=128, dropout=0.0
    B, T, C = 2, 8, 32
    H = 4 * C

    key = jax.random.PRNGKey(0)
    kx, kfc, kproj = jax.random.split(key, 3)

    x = jax.random.normal(kx, (B, T, C), dtype=jnp.float32)
    # nn.Linear weight shapes: c_fc.weight (4C, C), c_proj.weight (C, 4C)
    w_fc = jax.random.normal(kfc, (H, C), dtype=jnp.float32) * (1.0 / math.sqrt(C))
    w_proj = jax.random.normal(kproj, (C, H), dtype=jnp.float32) * (1.0 / math.sqrt(H))

    # One-time weight prep (transpose).  Kept f32 here so the tight-tolerance
    # reference check holds; use dtype=jnp.bfloat16 for the production path.
    wfc_t, wproj_t = prepare_ffn_params(w_fc, w_proj)

    out = feed_forward(x, wfc_t, wproj_t)
    out = jax.block_until_ready(out)

    ref = _reference(x, w_fc, w_proj)
    assert out.shape == (B, T, C)
    assert jnp.allclose(out, ref, atol=1e-5, rtol=1e-5), "mismatch vs reference"

    print("KERNEL_OK")
</pallas_src>

<mosaic_0001>
module attributes {stable_mosaic.version = 11 : i64} {
  func.func @_ffn_kernel(%arg0: i32, %arg1: i32, %arg2: memref<8x32xf32, #tpu.memory_space<vmem>>, %arg3: memref<32x128xf32, #tpu.memory_space<vmem>>, %arg4: memref<128x32xf32, #tpu.memory_space<vmem>>, %arg5: memref<8x32xf32, #tpu.memory_space<vmem>>, %arg6: memref<8x32xf32, #tpu.memory_space<vmem>>) attributes {dimension_semantics = [#tpu.dimension_semantics<parallel>, #tpu.dimension_semantics<arbitrary>], iteration_bounds = array<i64: 2, 1>, scalar_prefetch = 0 : i64, scratch_operands = 1 : i64, tpu.core_type = #tpu.core_type<tc>, window_params = [{transform_indices = @transform_0, window_bounds = array<i64: 8, 32>}, {transform_indices = @transform_1, window_bounds = array<i64: 32, 128>}, {transform_indices = @transform_2, window_bounds = array<i64: 128, 32>}, {transform_indices = @transform_3, window_bounds = array<i64: 8, 32>}]} {
    %c0_i32 = arith.constant 0 : i32
    %0 = arith.cmpi eq, %arg1, %c0_i32 : i32
    %1 = arith.extui %0 : i1 to i32
    %c0_i32_0 = arith.constant 0 : i32
    %2 = arith.cmpi ne, %1, %c0_i32_0 : i32
    scf.if %2 {
      %cst_17 = arith.constant 0.000000e+00 : f32
      %27 = vector.broadcast %cst_17 : f32 to vector<8x32xf32>
      %c0_18 = arith.constant 0 : index
      %c0_19 = arith.constant 0 : index
      %28 = vector.load %arg6[%c0_18, %c0_19] : memref<8x32xf32, #tpu.memory_space<vmem>>, vector<8x32xf32>
      tpu.vector_store %arg6[%c0_18, %c0_19], %27 {strides = array<i32>} : memref<8x32xf32, #tpu.memory_space<vmem>>, vector<8x32xf32>,
    } else {
    }
    %c0 = arith.constant 0 : index
    %c0_1 = arith.constant 0 : index
    %3 = vector.load %arg2[%c0, %c0_1] : memref<8x32xf32, #tpu.memory_space<vmem>>, vector<8x32xf32>
    %c0_2 = arith.constant 0 : index
    %c0_3 = arith.constant 0 : index
    %4 = vector.load %arg3[%c0_2, %c0_3] : memref<32x128xf32, #tpu.memory_space<vmem>>, vector<32x128xf32>
    %cst = arith.constant dense<0.000000e+00> : vector<8x128xf32>
    %5 = tpu.matmul %3, %4, %cst {dimension_numbers = #tpu.dot_dimension_numbers<[1], [0], [0], [1], [0, 0, 1, 1], [], []>} : vector<8x32xf32>, vector<32x128xf32>, vector<8x128xf32> -> vector<8x128xf32>
    %cst_4 = arith.constant 5.000000e-01 : f32
    %6 = vector.broadcast %cst_4 : f32 to vector<8x128xf32>
    %7 = arith.mulf %6, %5 : vector<8x128xf32>
    %8 = arith.mulf %5, %5 : vector<8x128xf32>
    %9 = arith.mulf %8, %5 : vector<8x128xf32>
    %cst_5 = arith.constant 4.471500e-02 : f32
    %10 = vector.broadcast %cst_5 : f32 to vector<8x128xf32>
    %11 = arith.mulf %10, %9 : vector<8x128xf32>
    %12 = arith.addf %5, %11 : vector<8x128xf32>
    %cst_6 = arith.constant 0.797884583 : f32
    %13 = vector.broadcast %cst_6 : f32 to vector<8x128xf32>
    %14 = arith.mulf %13, %12 : vector<8x128xf32>
    %15 = math.tanh %14 : vector<8x128xf32>
    %cst_7 = arith.constant 1.000000e+00 : f32
    %16 = vector.broadcast %cst_7 : f32 to vector<8x128xf32>
    %17 = arith.addf %16, %15 : vector<8x128xf32>
    %18 = arith.mulf %7, %17 : vector<8x128xf32>
    %c0_8 = arith.constant 0 : index
    %c0_9 = arith.constant 0 : index
    %19 = vector.load %arg6[%c0_8, %c0_9] : memref<8x32xf32, #tpu.memory_space<vmem>>, vector<8x32xf32>
    %c0_10 = arith.constant 0 : index
    %c0_11 = arith.constant 0 : index
    %20 = vector.load %arg4[%c0_10, %c0_11] : memref<128x32xf32, #tpu.memory_space<vmem>>, vector<128x32xf32>
    %cst_12 = arith.constant dense<0.000000e+00> : vector<8x32xf32>
    %21 = tpu.matmul %18, %20, %cst_12 {dimension_numbers = #tpu.dot_dimension_numbers<[1], [0], [0], [1], [0, 0, 1, 1], [], []>} : vector<8x128xf32>, vector<128x32xf32>, vector<8x32xf32> -> vector<8x32xf32>
    %22 = arith.addf %19, %21 : vector<8x32xf32>
    %c0_13 = arith.constant 0 : index
    %c0_14 = arith.constant 0 : index
    %23 = vector.load %arg6[%c0_13, %c0_14] : memref<8x32xf32, #tpu.memory_space<vmem>>, vector<8x32xf32>
    tpu.vector_store %arg6[%c0_13, %c0_14], %22 {strides = array<i32>} : memref<8x32xf32, #tpu.memory_space<vmem>>, vector<8x32xf32>,
    %c0_i32_15 = arith.constant 0 : i32
    %24 = arith.cmpi eq, %arg1, %c0_i32_15 : i32
    %25 = arith.extui %24 : i1 to i32
    %c0_i32_16 = arith.constant 0 : i32
    %26 = arith.cmpi ne, %25, %c0_i32_16 : i32
    scf.if %26 {
      %c0_17 = arith.constant 0 : index
      %c0_18 = arith.constant 0 : index
      %27 = vector.load %arg6[%c0_17, %c0_18] : memref<8x32xf32, #tpu.memory_space<vmem>>, vector<8x32xf32>
      %c0_19 = arith.constant 0 : index
      %c0_20 = arith.constant 0 : index
      %28 = vector.load %arg5[%c0_19, %c0_20] : memref<8x32xf32, #tpu.memory_space<vmem>>, vector<8x32xf32>
      tpu.vector_store %arg5[%c0_19, %c0_20], %27 {strides = array<i32>} : memref<8x32xf32, #tpu.memory_space<vmem>>, vector<8x32xf32>,
    } else {
    }
    return
  }
  func.func @transform_0(%arg0: i32, %arg1: i32) -> (i32, i32) {
    %c0_i32 = arith.constant 0 : i32
    %c0_i32_0 = arith.constant 0 : i32
    return %arg0, %c0_i32 : i32, i32
  }
  func.func @transform_1(%arg0: i32, %arg1: i32) -> (i32, i32) {
    %c0_i32 = arith.constant 0 : i32
    %c0_i32_0 = arith.constant 0 : i32
    return %c0_i32, %arg1 : i32, i32
  }
  func.func @transform_2(%arg0: i32, %arg1: i32) -> (i32, i32) {
    %c0_i32 = arith.constant 0 : i32
    %c0_i32_0 = arith.constant 0 : i32
    return %arg1, %c0_i32 : i32, i32
  }
  func.func @transform_3(%arg0: i32, %arg1: i32) -> (i32, i32) {
    %c0_i32 = arith.constant 0 : i32
    %c0_i32_0 = arith.constant 0 : i32
    return %arg0, %c0_i32 : i32, i32
  }
}

</mosaic_0001>

<bundles_post_ra>
// kernel: feed_forward.1
= control target key start
LH: loop header
LB: loop body
LE: loop exit
PB: predicated region body
PF: predicated region fallthrough
CT: control target
= control target key end

     0   :  { %8 = vsyncpa [#allocation4], 0  ;;  %s752_s0 = inlined_call_operand.vmem [shape: f32[16,32], index: 0, kind: input, shape index: {}]   ;;  %s753_s1 = inlined_call_operand.vmem [shape: f32[32,128], index: 1, kind: input, shape index: {}]   ;;  %s754_s2 = inlined_call_operand.vmem [shape: f32[128,32], index: 2, kind: input, shape index: {}]   ;;  %s755_s3 = inlined_call_operand.hbm [shape: f32[16,32], index: 3, kind: output, shape index: {}]  }
   0x1   :  { %10 = vsyncpa [#allocation4 + $0x1], 0  ;;  %s591_s12 = smov 0   ;;  %s593_s13 = smov 0  }
   0x2   :  { %s595_s14 = smov 0   ;;  %s597_s15 = smov 0  }
   0x3   :  { %s599_s16 = smov 0   ;;  %s601_s17 = smov 0  }
   0x4 LB: > { %s418_s18 = sadd.s32 4294967295, %s568_s17   ;;  %s419_s19 = sadd.s32 4294967294, %s568_s17   ;;  %s568_s17 = sphi %s601_s17, %s16_s17   ;;  %s564_s16 = sphi %s599_s16, %s762_s16   ;;  %s560_s15 = sphi %s597_s15, %s761_s15   ;;  %s556_s14 = sphi %s595_s14, %s760_s14   ;;  %s552_s13 = sphi %s593_s13, %s759_s13   ;;  %s548_s12 = sphi %s591_s12, %s758_s12  }
   0x5   : > { %s28_s20 = sadd.s32 1, %s564_s16  ;;  %s113_s21 = sadd.s32 1, %s556_s14 }
   0x6   : > { %p30_p0 = scmp.ge.s32.totalorder %s28_s20, 2  ;;  %p123_p1 = scmp.ne.s32.totalorder %s556_s14, %s552_s13 }
   0x7   : > { %p124_p2 = scmp.eq.s32.totalorder %s418_s18, 1  ;;  %p129_p3 = scmp.ne.s32.totalorder %s552_s13, %s548_s12 }
   0x8   : > { %s764_s20 = smov (%p30_p0, %s28_s20), 0  ;;  %p130_p5 = scmp.eq.s32.totalorder %s419_s19, 1 }
   0x9   : > { %p631_p4 = por %p124_p2, %p123_p1  ;;  %s110_s23 = ssub.s32 %s564_s16, %s764_s20 }
   0xa   : > { %p424_p6 = scmp.ge.s32.totalorder %s568_s17, 1  ;;  %p111_p7 = scmp.eq.s32.totalorder %s110_s23, 0 }
   0xb   : > { %p638_p8 = por %p130_p5, %p129_p3  ;;  %p171_p9 = scmp.lt.s32.totalorder %s568_s17, 3 }
   0xc   : > { %s644_s25 = scalar_select %p111_p7, %s556_s14, %s113_s21  }
   0xd   : > { %p172_p10 = pnand %p424_p6, %p171_p9 }
   0xe   : > { %p203_p11 = scmp.lt.s32.totalorder (!%p172_p10), %s560_s15, 1  ;;  %s200_s10 = sand.u32 (!%p172_p10), 1, %s552_s13  }
   0xf   : > { %175 = sbr.rel (%p172_p10) target bundleno = 314 (0x13a), region = 32  ;;  %s425_s11 = sshll.u32 (!%p172_p10), %s200_s10, 3 }
  0x10   : > { %s429_s18 = sshll.u32 (!%p172_p10), %s560_s15, 3  ;;  %s202_s26 = scalar_lea.vmem (!%p172_p10), [#allocation3], %s425_s11 }
  0x11   : > { %s316_s23 = scalar_lea.hbm (!%p172_p10), %s755_s3, %s429_s18  ;;  %s306_s29 = scalar_lea.sflag (!%p172_p10), [#allocation4], %s200_s10 }
  0x12   : > { %s320_s28 = sshll.u32 (!%p172_p10), %s316_s23, 4  ;;  %s510_s6 = scalar_lea.hbm (!%p172_p10), %s755_s3, 16  ;;  %s321_s28 = int_to_ptr.hbm [resolvable:$true] %s320_s28 }
  0x13   : > { %s504_s30 = sshra.s32 (!%p172_p10), %s321_s28, 4  ;;  %s505_s30 = int_to_ptr.hbm [resolvable:$true] %s504_s30 }
  0x14   : > { %v227_v0 = vld [vmem:[%s753_s1 + $0x18] sm:$0xff]  ;;  %v226_v1 = vld [vmem:[%s753_s1 + $0x10] sm:$0xff]  ;;  %vm221_vm0 = vcmask 261120   ;;  %v570_v2 = vmov 0.0   ;;  %v225_v5 = vld [vmem:[%s753_s1 + $0x8] sm:$0xff]  ;;  %s204_s9 = scalar_select %p203_p11, %s560_s15, 1 }
  0x15   : > { %244 = vmatpush.msra.mxu0 %v227_v0  ;;  %222 = vst.msk [vmem:[#allocation2] sm:$0xff] %vm221_vm0, %v570_v2  ;;  %v277_v3 = vld [vmem:[%s754_s2 + $0x78] sm:$0xff]  ;;  %v276_v4 = vld [vmem:[%s754_s2 + $0x70] sm:$0xff]  ;;  %v275_v6 = vld [vmem:[%s754_s2 + $0x68] sm:$0xff]  ;;  %s506_s15 = scalar_lea.hbm %s505_s30, 8  ;;  %p511_p1 = scmp.lt.s32.totalorder %s505_s30, %s755_s3 }
  0x16   : > { %278 = vmatpush.msra.mxu1 %v277_v3  ;;  %v224_v7 = vld [vmem:[%s753_s1] sm:$0xff]  ;;  %s426_s21 = sshll.u32 %s204_s9, 3  ;;  %v273_v10 = vld [vmem:[%s754_s2 + $0x58] sm:$0xff]  ;;  %v272_v11 = vld [vmem:[%s754_s2 + $0x50] sm:$0xff]  ;;  %p507_p12 = scmp.ne.s32.totalorder %s505_s30, %s506_s15 }
  0x17   : > { %245 = vmatpush.msra.mxu0 %v226_v1  ;;  %s206_s27 = scalar_lea.vmem %s752_s0, %s426_s21  ;;  %v274_v8 = vld [vmem:[%s754_s2 + $0x60] sm:$0xff]  ;;  %v271_v12 = vld [vmem:[%s754_s2 + $0x48] sm:$0xff]  ;;  %v269_v14 = vld [vmem:[%s754_s2 + $0x38] sm:$0xff]  ;;  %p512_p2 = scmp.lt.s32.totalorder %s510_s6, %s506_s15 }
  0x18   : > { %279 = vmatpush.msra.mxu1 %v276_v4  ;;  %v223_v9 = vld [vmem:[%s206_s27] sm:$0xff]  ;;  %v268_v15 = vld [vmem:[%s754_s2 + $0x30] sm:$0xff]  ;;  %v267_v16 = vld [vmem:[%s754_s2 + $0x28] sm:$0xff]  ;;  %s318_s27 = sshll.u32 %s202_s26, 4  ;;  %p508_p13 = pnand %p507_p12, %p631_p4  ;;  %s319_s27 = int_to_ptr.vmem [resolvable:$true] %s318_s27 }
  0x19   : > { %246 = vmatpush.msra.mxu0 %v225_v5  ;;  %v270_v13 = vld [vmem:[%s754_s2 + $0x40] sm:$0xff]  ;;  %v265_v18 = vld [vmem:[%s754_s2 + $0x18] sm:$0xff]  ;;  %v264_v19 = vld [vmem:[%s754_s2 + $0x10] sm:$0xff]  ;;  %p513_p3 = por %p512_p2, %p511_p1 }
  0x1a   : > { %280 = vmatpush.msra.mxu1 %v275_v6  ;;  %v266_v17 = vld [vmem:[%s754_s2 + $0x20] sm:$0xff]  ;;  %v263_v20 = vld [vmem:[%s754_s2 + $0x8] sm:$0xff]  ;;  %p509_p0 = pneg %p508_p13 }
  0x1b   : > { %247 = vmatpush.msra.mxu0 %v224_v7  ;;  %v262_v21 = vld [vmem:[%s754_s2] sm:$0xff] }
  0x1c   : > { %427 = vmatmul.msk.f32.vlgmr.msra.gmra.mxu0 %vm221_vm0, %v223_v9  ;;  %281 = vmatpush.msra.mxu1 %v274_v8  ;;  %v261_v32 = vld [vmem:[#allocation2] sm:$0xff]  ;;  %p514_p5 = pnand %p513_p3, %p509_p0 }
  0x1e   : > { %282 = vmatpush.msra.mxu1 %v273_v10 }
  0x20   : > { %283 = vmatpush.msra.mxu1 %v272_v11 }
  0x22   : > { %284 = vmatpush.msra.mxu1 %v271_v12 }
  0x24   : > { %285 = vmatpush.msra.mxu1 %v270_v13 }
  0x26   : > { %286 = vmatpush.msra.mxu1 %v269_v14 }
  0x28   : > { %287 = vmatpush.msra.mxu1 %v268_v15 }
  0x2a   : > { %288 = vmatpush.msra.mxu1 %v267_v16 }
  0x2c   : > { %289 = vmatpush.msra.mxu1 %v266_v17 }
  0x2e   : > { %290 = vmatpush.msra.mxu1 %v265_v18 }
  0x30   : > { %291 = vmatpush.msra.mxu1 %v264_v19 }
  0x32   : > { %292 = vmatpush.msra.mxu1 %v263_v20 }
  0x34   : > { %293 = vmatpush.msra.mxu1 %v262_v21 }
  0x99   : > { %v249_v22 = vpop.f32.mrf.mxu0 }
  0x9a   : > { %v253_v23 = vmul.f32 %v249_v22, %v249_v22  ;;  %v252_v29 = vmul.f32 0.5, %v249_v22 }
  0x9c   : > { %v254_v24 = vmul.f32 %v253_v23, %v249_v22 }
  0x9e   : > { %v255_v25 = vmul.f32 0.044715, %v254_v24 }
  0xa0   : > { %v256_v26 = vadd.f32 %v255_v25, %v249_v22 }
  0xa2   : > { %v257_v27 = vmul.f32 0.7978846, %v256_v26 }
  0xa4   : > { %488 = vtanh.f32 %v257_v27 }
  0xaa   : > { %v489_v28 = vpop.eup %488 }
  0xab   : > { %v259_v30 = vadd.f32 1.0, %v489_v28 }
  0xad   : > { %v260_v31 = vmul.f32 %v259_v30, %v252_v29 }
  0xaf   : > { %294 = vmatmul.f32.vlgmr.msra.gmra.mxu1 %v260_v31 }
 0x12c   : > { %v295_v33 = vpop.f32.mrf.mxu1 }
 0x12d   : > { %v298_v34 = vadd.f32 %v295_v33, %v261_v32 }
 0x12f   : > { %299 = vst.msk [vmem:[#allocation2] sm:$0xff] %vm221_vm0, %v298_v34 }
 0x136   : > { %v303_v35 = vld [vmem:[#allocation2] sm:$0xff] }
 0x137   : > { %304 = vst.msk [vmem:[%s202_s26] sm:$0xff] %vm221_vm0, %v303_v35 }
 0x138   : > { %517 = shalt.err (!%p514_p5)
}
 0x139   : > { %432 = dma.vmem_to_hbm [thread:$0]  (%p631_p4), %s319_s27, 128, %s321_s28, %s306_s29  }
 0x13a PF: > { %p438_p6 = scmp.ge.s32.totalorder %s568_s17, 2  ;;  %s332_s9 = sand.u32 1, %s548_s12  }
 0x13b   : > { %s333_s10 = scalar_lea.sflag [#allocation4], %s332_s9 }
 0x13c   : > { %p435_p7 = pnand %p438_p6, %p638_p8 }
 0x13e   : > { %p436_p9 = pneg %p435_p7 }
 0x140   : > { %543 = dma.done.wait (%p436_p9), %s333_s10, 128  }
 0x141   : > { %545 = vsyncadd (%p436_p9), %s333_s10, 4294967168  ;;  %s16_s17 = sadd.s32 1, %s568_s17   ;;  %s758_s12 = smov %s552_s13 }
 0x142   : > { %p13_p10 = scmp.ge.s32.totalorder %s16_s17, 4   ;;  %s759_s13 = smov %s556_s14 }
 0x143   : > { %s760_s14 = smov %s644_s25  ;;  %s761_s15 = smov %s564_s16 }
 0x144   : > { %s762_s16 = smov %s764_s20  ;;  %15 = sbr.rel (!%p13_p10) target bundleno = 4 (0x4), region = 81 }
 0x149   :  { %339 = vsyncpa [#allocation4], 1 }
 0x14a   :  { %341 = vsyncpa [#allocation4 + $0x1], 1 }

</bundles_post_ra>
